<compile_context>
chip_gen: v5e
topology: v5e:2x2
jax: 0.10.0
libtpu: 0.0.40
codegen_flags: <defaults>
</compile_context>

<pallas_src>
import functools

import jax
import jax.numpy as jnp
from jax.experimental import pallas as pl
from jax.experimental.pallas import tpu as pltpu


_LANES = 128        # vreg lane width
_MAX_CHUNKS = 64    # cap on the unrolled lane-fold loop in the stats kernel


# ---------------------------------------------------------------------------
# Kernels
# ---------------------------------------------------------------------------
def _bn_stats_kernel(x_ref, sum_ref, sumsq_ref, acc_sum, acc_sq,
                     *, hw, t_hw, n_lanes):
    """Accumulate per-row sum and sum-of-squares.

    x_ref:     (r_tile, t_hw)   input tile (rows = (batch, channel) pairs)
    sum_ref:   (r_tile, 1)      f32 output, resident across the hw axis
    sumsq_ref: (r_tile, 1)      f32 output, resident across the hw axis
    acc_sum:   (r_tile, n_lanes) f32 VMEM scratch (lane-wide partial sums)
    acc_sq:    (r_tile, n_lanes) f32 VMEM scratch
    """
    j = pl.program_id(1)

    @pl.when(j == 0)
    def _init():
        acc_sum[...] = jnp.zeros_like(acc_sum)
        acc_sq[...] = jnp.zeros_like(acc_sq)

    x = x_ref[...].astype(jnp.float32)                       # (r_tile, t_hw)

    # Mask the ragged spatial tail (only generated when HW % t_hw != 0).
    if hw % t_hw != 0:
        lane = jax.lax.broadcasted_iota(jnp.int32, (1, t_hw), 1)
        x = jnp.where(j * t_hw + lane < hw, x, 0.0)

    # Fold the tile into n_lanes-wide partial sums with pure VALU adds; the
    # expensive cross-lane (XLU) reduce is deferred to the last hw step.
    ps = jnp.zeros(acc_sum.shape, jnp.float32)
    pq = jnp.zeros(acc_sq.shape, jnp.float32)
    for k in range(t_hw // n_lanes):                          # lane-aligned slices
        chunk = x[:, k * n_lanes:(k + 1) * n_lanes]
        ps = ps + chunk
        pq = pq + chunk * chunk
    acc_sum[...] += ps
    acc_sq[...] += pq

    @pl.when(j == pl.num_programs(1) - 1)
    def _finalize():
        sum_ref[...] = jnp.sum(acc_sum[...], axis=-1, keepdims=True)
        sumsq_ref[...] = jnp.sum(acc_sq[...], axis=-1, keepdims=True)


def _bn_apply_kernel(x_ref, scale_ref, shift_ref, o_ref, *, act: bool):
    """Apply y = x * scale + shift (+ optional ReLU).

    x_ref:     (r_tile, t_hw)
    scale_ref: (r_tile, 1) f32   gamma * rsqrt(var + eps)   (per row)
    shift_ref: (r_tile, 1) f32   beta - mean * scale        (per row)
    o_ref:     (r_tile, t_hw)
    """
    x = x_ref[...].astype(jnp.float32)
    # scale/shift are loop-invariant (r_tile, 1) operands: Mosaic hoists the
    # lane splat once per tile; an explicit full-tile broadcast_to would only
    # add a tile-sized VMEM temporary, so the implicit broadcast is kept.
    scale = scale_ref[...]
    shift = shift_ref[...]
    y = x * scale + shift                                     # 2 VALU ops/elem
    if act:
        y = jnp.maximum(y, 0.0)
    o_ref[...] = y.astype(o_ref.dtype)


# ---------------------------------------------------------------------------
# Tiling helpers
# ---------------------------------------------------------------------------
def _vmem_budget():
    """Per-generation (max_tile_bytes, vmem_limit_bytes)."""
    cap = 64 * 1024 * 1024
    try:
        info = pltpu.get_tpu_info()
        cap = int(getattr(info, "vmem_capacity_bytes", cap))
    except Exception:
        pass
    if cap >= 96 * 1024 * 1024:
        # v5e / v6e: 128 MiB physical VMEM -> big tiles, 64 MiB scoped limit.
        return 6 * 1024 * 1024, 64 * 1024 * 1024
    # v7x: 64 MiB physical VMEM -> smaller tiles, leave headroom.
    return 4 * 1024 * 1024, 44 * 1024 * 1024


def _choose_tiles(n_rows, hw, itemsize, max_tile_bytes):
    """Pick (r_tile, t_hw).

    r_tile: full rows when small, else 256 (multiple of 16 so f32/bf16 sublane
            packing stays aligned; >=2 row tiles lets v7x's two TensorCores
            split the stats pass).
    t_hw:   largest multiple of 128 that (a) does not exceed HW, (b) keeps a
            tile under max_tile_bytes (dtype-aware), (c) keeps the in-kernel
            lane-fold unroll bounded.  When HW < 128 the full dim is used.
    """
    r_tile = n_rows if n_rows <= 256 else 256
    if hw < _LANES:
        t_hw = hw
    else:
        cap_lanes = max(_LANES,
                        (max_tile_bytes // (itemsize * r_tile)) // _LANES * _LANES)
        t_hw = min((hw // _LANES) * _LANES, cap_lanes, _MAX_CHUNKS * _LANES)
    return r_tile, t_hw


# ---------------------------------------------------------------------------
# Wrapper
# ---------------------------------------------------------------------------
def bn_act(x_nchw, gamma, beta, *, eps: float = 1e-5, act: bool = True):
    """BNAct forward on an NCHW input. gamma/beta have shape (C,)."""
    n, c, h, w = x_nchw.shape
    hw = h * w
    rows = n * c
    x2d = x_nchw.reshape(rows, hw)            # zero-copy view of contiguous NCHW

    itemsize = x_nchw.dtype.itemsize
    max_tile_bytes, vmem_limit = _vmem_budget()
    r_tile, t_hw = _choose_tiles(rows, hw, itemsize, max_tile_bytes)
    n_lanes = _LANES if t_hw % _LANES == 0 else t_hw
    grid = (pl.cdiv(rows, r_tile), pl.cdiv(hw, t_hw))
    x_bytes = rows * hw * itemsize

    # ---- Pass 1: per-row sum / sum-of-squares (resident accumulators) ----
    sums, sumsqs = pl.pallas_call(
        functools.partial(_bn_stats_kernel, hw=hw, t_hw=t_hw, n_lanes=n_lanes),
        out_shape=(
            jax.ShapeDtypeStruct((rows, 1), jnp.float32),
            jax.ShapeDtypeStruct((rows, 1), jnp.float32),
        ),
        grid=grid,
        in_specs=[
            pl.BlockSpec((r_tile, t_hw), lambda ri, j: (ri, j)),
        ],
        out_specs=(
            pl.BlockSpec((r_tile, 1), lambda ri, j: (ri, 0)),
            pl.BlockSpec((r_tile, 1), lambda ri, j: (ri, 0)),
        ),
        scratch_shapes=[
            pltpu.VMEM((r_tile, n_lanes), jnp.float32),
            pltpu.VMEM((r_tile, n_lanes), jnp.float32),
        ],
        compiler_params=pltpu.CompilerParams(
            dimension_semantics=("parallel", "arbitrary"),
            vmem_limit_bytes=vmem_limit),
        cost_estimate=pl.CostEstimate(
            flops=3 * rows * hw, transcendentals=0,
            bytes_accessed=x_bytes + 2 * rows * 4),
    )(x2d)

    # Tiny (N, C) math on the host-side graph: reduce over batch, fold BN into
    # per-row scale/shift.
    count = jnp.float32(n * hw)
    ch_sum = jnp.sum(sums.reshape(n, c), axis=0)              # (C,)
    ch_sq = jnp.sum(sumsqs.reshape(n, c), axis=0)             # (C,)
    mean = ch_sum / count
    # TODO(synk): E[x^2]-E[x]^2 in f32 loses precision when |mean| >> std; a
    # mean-centered second stats pass would track PyTorch more tightly if needed.
    var = jnp.maximum(ch_sq / count - mean * mean, 0.0)       # biased variance
    inv_std = jax.lax.rsqrt(var + jnp.float32(eps))
    scale_c = gamma.astype(jnp.float32) * inv_std             # (C,)
    shift_c = beta.astype(jnp.float32) - mean * scale_c       # (C,)
    scale = jnp.tile(scale_c, (n,)).reshape(rows, 1)          # per-row
    shift = jnp.tile(shift_c, (n,)).reshape(rows, 1)

    # ---- Pass 2: normalize + affine + optional ReLU (fully parallel) ----
    out2d = pl.pallas_call(
        functools.partial(_bn_apply_kernel, act=act),
        out_shape=jax.ShapeDtypeStruct((rows, hw), x_nchw.dtype),
        grid=grid,
        in_specs=[
            pl.BlockSpec((r_tile, t_hw), lambda ri, j: (ri, j)),
            pl.BlockSpec((r_tile, 1), lambda ri, j: (ri, 0)),
            pl.BlockSpec((r_tile, 1), lambda ri, j: (ri, 0)),
        ],
        out_specs=pl.BlockSpec((r_tile, t_hw), lambda ri, j: (ri, j)),
        compiler_params=pltpu.CompilerParams(
            dimension_semantics=("parallel", "parallel"),
            vmem_limit_bytes=vmem_limit),
        cost_estimate=pl.CostEstimate(
            flops=3 * rows * hw, transcendentals=0,
            bytes_accessed=2 * x_bytes + 2 * rows * 4),
    )(x2d, scale, shift)

    return out2d.reshape(n, c, h, w)


# ---------------------------------------------------------------------------
# Pure-JAX reference (torch BatchNorm2d training-mode forward + optional ReLU)
# ---------------------------------------------------------------------------
def _reference_bn_act(x_nchw, gamma, beta, eps=1e-5, act=True):
    mean = jnp.mean(x_nchw, axis=(0, 2, 3), keepdims=True)
    var = jnp.mean((x_nchw - mean) ** 2, axis=(0, 2, 3), keepdims=True)
    y = (x_nchw - mean) / jnp.sqrt(var + eps)
    y = y * gamma.reshape(1, -1, 1, 1) + beta.reshape(1, -1, 1, 1)
    if act:
        y = jnp.maximum(y, 0.0)
    return y


if __name__ == "__main__":
    key = jax.random.PRNGKey(0)

    # --- Test 1: small NCHW input consistent with BatchNorm2d(num_features=4).
    N, C, H, W = 2, 4, 16, 16
    k1, k2 = jax.random.split(key)
    x = jax.random.normal(k1, (N, C, H, W), dtype=jnp.float32)

    # PyTorch BatchNorm2d defaults: weight=1, bias=0.
    gamma = jnp.ones((C,), dtype=jnp.float32)
    beta = jnp.zeros((C,), dtype=jnp.float32)

    out = bn_act(x, gamma, beta, eps=1e-5, act=True)
    out = jax.block_until_ready(out)
    ref = _reference_bn_act(x, gamma, beta, act=True)
    assert out.shape == (N, C, H, W)
    assert jnp.allclose(out, ref, atol=1e-4, rtol=1e-4)

    # --- Test 2: ragged spatial size (HW not a multiple of 128) exercises the
    # cdiv grid + lane-masked tail, and act=False exercises the no-ReLU branch.
    H2, W2 = 15, 15
    x2 = jax.random.normal(k2, (N, C, H2, W2), dtype=jnp.float32)
    out2 = bn_act(x2, gamma, beta, eps=1e-5, act=False)
    out2 = jax.block_until_ready(out2)
    ref2 = _reference_bn_act(x2, gamma, beta, act=False)
    assert out2.shape == (N, C, H2, W2)
    assert jnp.allclose(out2, ref2, atol=1e-4, rtol=1e-4)

    print("KERNEL_OK")
</pallas_src>

<mosaic_0001>
module attributes {stable_mosaic.version = 11 : i64} {
  func.func @_bn_stats_kernel(%arg0: i32, %arg1: i32, %arg2: memref<8x256xf32, #tpu.memory_space<vmem>>, %arg3: memref<8x1xf32, #tpu.memory_space<vmem>>, %arg4: memref<8x1xf32, #tpu.memory_space<vmem>>, %arg5: memref<8x128xf32, #tpu.memory_space<vmem>>, %arg6: memref<8x128xf32, #tpu.memory_space<vmem>>) attributes {dimension_semantics = [#tpu.dimension_semantics<parallel>, #tpu.dimension_semantics<arbitrary>], iteration_bounds = array<i64: 1, 1>, scalar_prefetch = 0 : i64, scratch_operands = 2 : i64, tpu.core_type = #tpu.core_type<tc>, window_params = [{transform_indices = @transform_0, window_bounds = array<i64: 8, 256>}, {transform_indices = @transform_1, window_bounds = array<i64: 8, 1>}, {transform_indices = @transform_2, window_bounds = array<i64: 8, 1>}]} {
    %c0_i32 = arith.constant 0 : i32
    %0 = arith.cmpi eq, %arg1, %c0_i32 : i32
    %1 = arith.extui %0 : i1 to i32
    %c0_i32_0 = arith.constant 0 : i32
    %2 = arith.cmpi ne, %1, %c0_i32_0 : i32
    scf.if %2 {
      %cst_13 = arith.constant 0.000000e+00 : f32
      %23 = vector.broadcast %cst_13 : f32 to vector<8x128xf32>
      %c0_14 = arith.constant 0 : index
      %c0_15 = arith.constant 0 : index
      %24 = vector.load %arg5[%c0_14, %c0_15] : memref<8x128xf32, #tpu.memory_space<vmem>>, vector<8x128xf32>
      tpu.vector_store %arg5[%c0_14, %c0_15], %23 {strides = array<i32>} : memref<8x128xf32, #tpu.memory_space<vmem>>, vector<8x128xf32>,
      %cst_16 = arith.constant 0.000000e+00 : f32
      %25 = vector.broadcast %cst_16 : f32 to vector<8x128xf32>
      %c0_17 = arith.constant 0 : index
      %c0_18 = arith.constant 0 : index
      %26 = vector.load %arg6[%c0_17, %c0_18] : memref<8x128xf32, #tpu.memory_space<vmem>>, vector<8x128xf32>
      tpu.vector_store %arg6[%c0_17, %c0_18], %25 {strides = array<i32>} : memref<8x128xf32, #tpu.memory_space<vmem>>, vector<8x128xf32>,
    } else {
    }
    %c0 = arith.constant 0 : index
    %c0_1 = arith.constant 0 : index
    %3 = vector.load %arg2[%c0, %c0_1] : memref<8x256xf32, #tpu.memory_space<vmem>>, vector<8x256xf32>
    %cst = arith.constant 0.000000e+00 : f32
    %4 = vector.broadcast %cst : f32 to vector<8x128xf32>
    %cst_2 = arith.constant 0.000000e+00 : f32
    %5 = vector.broadcast %cst_2 : f32 to vector<8x128xf32>
    %6 = vector.extract_strided_slice %3 {offsets = [0, 0], sizes = [8, 128], strides = [1, 1]} : vector<8x256xf32> to vector<8x128xf32>
    %7 = arith.addf %4, %6 : vector<8x128xf32>
    %8 = arith.mulf %6, %6 : vector<8x128xf32>
    %9 = arith.addf %5, %8 : vector<8x128xf32>
    %10 = vector.extract_strided_slice %3 {offsets = [0, 128], sizes = [8, 128], strides = [1, 1]} : vector<8x256xf32> to vector<8x128xf32>
    %11 = arith.addf %7, %10 : vector<8x128xf32>
    %12 = arith.mulf %10, %10 : vector<8x128xf32>
    %13 = arith.addf %9, %12 : vector<8x128xf32>
    %c0_3 = arith.constant 0 : index
    %c0_4 = arith.constant 0 : index
    %14 = vector.load %arg5[%c0_3, %c0_4] : memref<8x128xf32, #tpu.memory_space<vmem>>, vector<8x128xf32>
    %15 = arith.addf %14, %11 : vector<8x128xf32>
    %c0_5 = arith.constant 0 : index
    %c0_6 = arith.constant 0 : index
    %16 = vector.load %arg5[%c0_5, %c0_6] : memref<8x128xf32, #tpu.memory_space<vmem>>, vector<8x128xf32>
    tpu.vector_store %arg5[%c0_5, %c0_6], %15 {strides = array<i32>} : memref<8x128xf32, #tpu.memory_space<vmem>>, vector<8x128xf32>,
    %c0_7 = arith.constant 0 : index
    %c0_8 = arith.constant 0 : index
    %17 = vector.load %arg6[%c0_7, %c0_8] : memref<8x128xf32, #tpu.memory_space<vmem>>, vector<8x128xf32>
    %18 = arith.addf %17, %13 : vector<8x128xf32>
    %c0_9 = arith.constant 0 : index
    %c0_10 = arith.constant 0 : index
    %19 = vector.load %arg6[%c0_9, %c0_10] : memref<8x128xf32, #tpu.memory_space<vmem>>, vector<8x128xf32>
    tpu.vector_store %arg6[%c0_9, %c0_10], %18 {strides = array<i32>} : memref<8x128xf32, #tpu.memory_space<vmem>>, vector<8x128xf32>,
    %c0_i32_11 = arith.constant 0 : i32
    %20 = arith.cmpi eq, %arg1, %c0_i32_11 : i32
    %21 = arith.extui %20 : i1 to i32
    %c0_i32_12 = arith.constant 0 : i32
    %22 = arith.cmpi ne, %21, %c0_i32_12 : i32
    scf.if %22 {
      %c0_13 = arith.constant 0 : index
      %c0_14 = arith.constant 0 : index
      %23 = vector.load %arg5[%c0_13, %c0_14] : memref<8x128xf32, #tpu.memory_space<vmem>>, vector<8x128xf32>
      %cst_15 = arith.constant dense<0.000000e+00> : vector<8xf32>
      %24 = vector.multi_reduction <add>, %23, %cst_15 [1] : vector<8x128xf32> to vector<8xf32>
      %25 = vector.shape_cast %24 : vector<8xf32> to vector<8x1xf32>
      %c0_16 = arith.constant 0 : index
      %c0_17 = arith.constant 0 : index
      %26 = vector.load %arg3[%c0_16, %c0_17] : memref<8x1xf32, #tpu.memory_space<vmem>>, vector<8x1xf32>
      tpu.vector_store %arg3[%c0_16, %c0_17], %25 {strides = array<i32>} : memref<8x1xf32, #tpu.memory_space<vmem>>, vector<8x1xf32>,
      %c0_18 = arith.constant 0 : index
      %c0_19 = arith.constant 0 : index
      %27 = vector.load %arg6[%c0_18, %c0_19] : memref<8x128xf32, #tpu.memory_space<vmem>>, vector<8x128xf32>
      %cst_20 = arith.constant dense<0.000000e+00> : vector<8xf32>
      %28 = vector.multi_reduction <add>, %27, %cst_20 [1] : vector<8x128xf32> to vector<8xf32>
      %29 = vector.shape_cast %28 : vector<8xf32> to vector<8x1xf32>
      %c0_21 = arith.constant 0 : index
      %c0_22 = arith.constant 0 : index
      %30 = vector.load %arg4[%c0_21, %c0_22] : memref<8x1xf32, #tpu.memory_space<vmem>>, vector<8x1xf32>
      tpu.vector_store %arg4[%c0_21, %c0_22], %29 {strides = array<i32>} : memref<8x1xf32, #tpu.memory_space<vmem>>, vector<8x1xf32>,
    } else {
    }
    return
  }
  func.func @transform_0(%arg0: i32, %arg1: i32) -> (i32, i32) {
    %c0_i32 = arith.constant 0 : i32
    return %arg0, %arg1 : i32, i32
  }
  func.func @transform_1(%arg0: i32, %arg1: i32) -> (i32, i32) {
    %c0_i32 = arith.constant 0 : i32
    %c0_i32_0 = arith.constant 0 : i32
    return %arg0, %c0_i32 : i32, i32
  }
  func.func @transform_2(%arg0: i32, %arg1: i32) -> (i32, i32) {
    %c0_i32 = arith.constant 0 : i32
    %c0_i32_0 = arith.constant 0 : i32
    return %arg0, %c0_i32 : i32, i32
  }
}

</mosaic_0001>

<bundles_post_ra>
// kernel: tpu_custom_call.1
= control target key start
LH: loop header
LB: loop body
LE: loop exit
PB: predicated region body
PF: predicated region fallthrough
CT: control target
= control target key end

     0   :  { %8 = vsyncpa [#allocation5], 0  ;;  %s92_s12 = smov [#allocation4]   ;;  %s117_s0 = inlined_call_operand.hbm [shape: f32[8,256], index: 0, kind: input, shape index: {}]   ;;  %s118_s1 = inlined_call_operand.vmem [shape: f32[8,1], index: 1, kind: output, shape index: {0}]   ;;  %s119_s2 = inlined_call_operand.vmem [shape: f32[8,1], index: 2, kind: output, shape index: {1}]  }
   0x1   :  { %s14_s11 = sshll.u32 %s117_s0, 4  ;;  %s16_s13 = sshll.u32 %s92_s12, 4  ;;  %s15_s11 = int_to_ptr.hbm [resolvable:$true] %s14_s11  ;;  %s17_s13 = int_to_ptr.vmem [resolvable:$true] %s16_s13 }
   0x2   :  { %19 = dma.hbm_to_vmem [thread:$0]  %s15_s11, 256, %s17_s13, [#allocation5]  }
   0x3   :  { %90 = dma.done.wait [#allocation5], 256  }
   0x4   :  { %91 = vsyncadd [#allocation5], 4294967040  ;;  %v30_v0 = vld [vmem:[#allocation4] sm:$0xff]  ;;  %v31_v1 = vld [vmem:[#allocation4 + $0x8] sm:$0xff]  ;;  %vm50_vm0 = vcmask 7168  }
   0x5   :  { %v35_v2 = vadd.f32 %v31_v1, %v30_v0  ;;  %v36_v3 = vmul.f32 %v31_v1, %v31_v1  ;;  %v33_v4 = vmul.f32 %v30_v0, %v30_v0 }
   0x7   :  { %48 = vadd.xlane.f32.xlu0 %v35_v2  ;;  %v37_v5 = vadd.f32 %v36_v3, %v33_v4 }
   0xf   :  { %53 = vadd.xlane.f32.xlu0 %v37_v5 }
  0x7a   :  { %v49_v6 = vpop.xlane.xlu0 %48 }
  0x7b   :  { %51 = vst.msk [vmem:[%s118_s1] sm:$0xff] %vm50_vm0, %v49_v6 }
  0x82   :  { %v54_v7 = vpop.xlane.xlu0 %53 }
  0x83   :  { %55 = vst.msk [vmem:[%s119_s2] sm:$0xff] %vm50_vm0, %v54_v7 }
  0x84   :  { %64 = vsyncpa [#allocation5], 1 }

</bundles_post_ra>
